<compile_context>
chip_gen: v7x
topology: tpu7x:2x2x1
jax: 0.10.0
libtpu: 0.0.40
codegen_flags: <defaults>
</compile_context>

<pallas_src>
import functools

import jax
import jax.numpy as jnp
from jax import lax
from jax.experimental import pallas as pl
from jax.experimental.pallas import tpu as pltpu

_SQRT2_INV = 0.7071067811865476
_CHUNK_BYTES = 4 << 20           # per-block spatial chunk cap (two-pass path)
_FUSED_BYTES = 4 << 20           # full (C, HWp) block <= this -> fused single pass
_VMEM_LIMIT = 32 * 1024 * 1024   # scoped-VMEM budget, safe on v5e/v6e/v7x


def _round_up(x, m):
    return (x + m - 1) // m * m


def _erf_approx(x):
    # Abramowitz & Stegun 7.1.26, |err| <= 1.5e-7 (float32-level accuracy).
    # Only exp/mul/add/where -> guaranteed to lower in Mosaic.
    a1, a2, a3, a4, a5 = 0.254829592, -0.284496736, 1.421413741, -1.453152027, 1.061405429
    p = 0.3275911
    sign = jnp.where(x >= 0.0, 1.0, -1.0)
    ax = jnp.abs(x)
    t = 1.0 / (1.0 + p * ax)
    poly = ((((a5 * t + a4) * t + a3) * t + a2) * t + a1) * t
    return sign * (1.0 - poly * jnp.exp(-ax * ax))


def _gelu_exact(x):
    # PyTorch nn.GELU() default = exact (erf-based) GELU.
    return 0.5 * x * (1.0 + _erf_approx(x * _SQRT2_INV))


def _se_gate(stats, w1, wdw, w2):
    """stats: (C, 2) with columns [avg | max].  Both branches share ONE pair of
    tiny MXU matmuls.  Returns the per-channel sigmoid gate, (C, 1) float32."""
    # fc1[0]: 1x1 conv == (mid, C) @ (C, 2)
    h = jnp.dot(w1, stats, preferred_element_type=jnp.float32)
    # fc1[1]: depthwise 3x3, pad=1, on a 1x1 input == per-channel center-tap scale
    h = h * wdw                                                   # (mid, 2) * (mid, 1)
    h = _gelu_exact(h)
    # fc2: 1x1 conv == (C, mid) @ (mid, 2)
    out = jnp.dot(w2, h, preferred_element_type=jnp.float32)      # (C, 2)
    logits = jnp.sum(out, axis=-1, keepdims=True)                 # avg branch + max branch
    return jax.nn.sigmoid(logits)                                 # (C, 1)


def _accumulate(x_ref, s0, m0, nsub, base, hw, masked):
    """VALU-only accumulation of spatial sum/max over 128-lane slices of the
    (C, nsub*128) block x_ref.  Cross-lane (XLU) reduction is deferred to the
    caller's epilogue.  Padded-tail lanes (index >= hw) are masked to -inf for
    the max branch; the sum is safe because the pad is zeros."""
    C = x_ref.shape[0]

    def step(j, carry):
        s, m = carry
        off = pl.multiple_of(j * 128, 128)
        xj = x_ref[:, pl.ds(off, 128)].astype(jnp.float32)
        if masked:
            lane = lax.broadcasted_iota(jnp.int32, (C, 128), 1) + (base + off)
            xm = jnp.where(lane < hw, xj, -jnp.inf)
        else:
            xm = xj
        return s + xj, jnp.maximum(m, xm)

    return lax.fori_loop(0, nsub, step, (s0, m0), unroll=(nsub <= 8))


# ----------------------------- fused single pass -----------------------------

def _fused_kernel(x_ref, w1_ref, wdw_ref, w2_ref, o_ref, *, hw, masked):
    """Pool + SE + apply for one batch element; the whole (C, HWp) block is
    resident in VMEM, so x is read from HBM exactly once."""
    C, hwp = x_ref.shape
    s0 = jnp.zeros((C, 128), jnp.float32)
    m0 = jnp.full((C, 128), -jnp.inf, jnp.float32)
    s, m = _accumulate(x_ref, s0, m0, hwp // 128, 0, hw, masked)

    avg = jnp.sum(s, axis=-1, keepdims=True) * (1.0 / float(hw))   # (C, 1)
    mx = jnp.max(m, axis=-1, keepdims=True)                        # (C, 1)
    col = lax.broadcasted_iota(jnp.int32, (C, 2), 1)
    stats = jnp.where(col == 0, avg, mx)                           # (C, 2), no minor concat
    gate = _se_gate(stats, w1_ref[...], wdw_ref[...], w2_ref[...])

    # Apply in the input dtype (no f32 upcast in the elementwise hot path).
    o_ref[...] = x_ref[...] * gate.astype(o_ref.dtype)


# ------------------------------ two-pass (tiled) ------------------------------

def _pool_gate_kernel(x_ref, w1_ref, wdw_ref, w2_ref, gate_ref, sum_sc, max_sc,
                      *, hw, chunk, masked):
    """Pass 1: accumulate spatial sum/max over H*W chunks (VALU), run the fused
    SE path at the last chunk and emit a lane-dense (C, 128) gate slab."""
    c = pl.program_id(1)

    @pl.when(c == 0)
    def _():
        sum_sc[...] = jnp.zeros_like(sum_sc)
        max_sc[...] = jnp.full_like(max_sc, -jnp.inf)

    s, m = _accumulate(x_ref, sum_sc[...], max_sc[...], chunk // 128, c * chunk,
                       hw, masked)
    sum_sc[...] = s
    max_sc[...] = m

    @pl.when(c == pl.num_programs(1) - 1)
    def _():
        C = sum_sc.shape[0]
        avg = jnp.sum(sum_sc[...], axis=-1, keepdims=True) * (1.0 / float(hw))
        mx = jnp.max(max_sc[...], axis=-1, keepdims=True)
        col = lax.broadcasted_iota(jnp.int32, (C, 2), 1)
        stats = jnp.where(col == 0, avg, mx)
        gate = _se_gate(stats, w1_ref[...], wdw_ref[...], w2_ref[...])   # (C, 1)
        gate_ref[...] = jnp.broadcast_to(gate, gate_ref.shape)          # (C, 128) lane-dense


def _apply_kernel(x_ref, gate_ref, o_ref):
    """Pass 2: out = x * gate.  Multiply runs in the input dtype; gate is read
    from a lane-dense (C, 128) block (value replicated across lanes)."""
    g = gate_ref[...][:, 0:1].astype(o_ref.dtype)
    o_ref[...] = x_ref[...] * g


# --------------------------------- wrapper ------------------------------------

def _plan_chunk(hw_pad, C, itemsize):
    """Lane-dense H*W chunk: largest multiple of 128 that divides hw_pad, capped
    at ~4 MiB per block (double-buffered in+out blocks stay <= ~16-17 MiB, well
    inside the 32 MiB scoped VMEM we request on every chip generation)."""
    cap = max(128, (_CHUNK_BYTES // max(1, C * itemsize)) // 128 * 128)
    cap = min(cap, hw_pad)
    k = cap
    while k >= 128:
        if hw_pad % k == 0:
            return k
        k -= 128
    return 128


@jax.jit
def multi_scale_channel_attention(x_nchw, w1, w_dw, w2):
    """x: (B, C, H, W); w1: (mid, C, 1, 1); w_dw: (mid, 1, 3, 3); w2: (C, mid, 1, 1)."""
    B, C, H, W = x_nchw.shape
    mid = w1.shape[0]
    hw = H * W
    itemsize = jnp.dtype(x_nchw.dtype).itemsize

    w1_m = w1.reshape(mid, C)
    wdw_c = w_dw[:, 0, 1, 1].reshape(mid, 1)   # center tap of the depthwise 3x3
    w2_m = w2.reshape(C, mid)

    hw_pad = _round_up(hw, 128)
    masked = hw_pad != hw
    x3 = x_nchw.reshape(B, C, hw)              # free: contiguous NCHW view
    if masked:
        # Zero-pad to a lane-dense multiple of 128 (unmasked vst; bounded blocks).
        x3 = jnp.pad(x3, ((0, 0), (0, 0), (0, hw_pad - hw)))

    if C * hw_pad * itemsize <= _FUSED_BYTES:
        # --------- single fused pass: 2x|x| HBM traffic, one launch ---------
        out3 = pl.pallas_call(
            functools.partial(_fused_kernel, hw=hw, masked=masked),
            out_shape=jax.ShapeDtypeStruct((B, C, hw_pad), x_nchw.dtype),
            grid_spec=pltpu.PrefetchScalarGridSpec(
                num_scalar_prefetch=0,
                grid=(B,),
                in_specs=[
                    pl.BlockSpec((None, C, hw_pad), lambda b: (b, 0, 0)),
                    pl.BlockSpec((mid, C), lambda b: (0, 0)),
                    pl.BlockSpec((mid, 1), lambda b: (0, 0)),
                    pl.BlockSpec((C, mid), lambda b: (0, 0)),
                ],
                out_specs=pl.BlockSpec((None, C, hw_pad), lambda b: (b, 0, 0)),
            ),
            compiler_params=pltpu.CompilerParams(
                dimension_semantics=("parallel",),
                vmem_limit_bytes=_VMEM_LIMIT),
        )(x3, w1_m, wdw_c, w2_m)
    else:
        # ------------------- two-pass tiled path (large H*W) -------------------
        chunk = _plan_chunk(hw_pad, C, itemsize)
        n_chunks = hw_pad // chunk

        gate = pl.pallas_call(
            functools.partial(_pool_gate_kernel, hw=hw, chunk=chunk, masked=masked),
            out_shape=jax.ShapeDtypeStruct((B, C, 128), jnp.float32),
            grid_spec=pltpu.PrefetchScalarGridSpec(
                num_scalar_prefetch=0,
                grid=(B, n_chunks),
                in_specs=[
                    pl.BlockSpec((None, C, chunk), lambda b, c: (b, 0, c)),
                    pl.BlockSpec((mid, C), lambda b, c: (0, 0)),
                    pl.BlockSpec((mid, 1), lambda b, c: (0, 0)),
                    pl.BlockSpec((C, mid), lambda b, c: (0, 0)),
                ],
                out_specs=pl.BlockSpec((None, C, 128), lambda b, c: (b, 0, 0)),
                scratch_shapes=[pltpu.VMEM((C, 128), jnp.float32),
                                pltpu.VMEM((C, 128), jnp.float32)],
            ),
            compiler_params=pltpu.CompilerParams(
                dimension_semantics=("parallel", "arbitrary"),
                vmem_limit_bytes=_VMEM_LIMIT),
        )(x3, w1_m, wdw_c, w2_m)

        out3 = pl.pallas_call(
            _apply_kernel,
            out_shape=jax.ShapeDtypeStruct((B, C, hw_pad), x_nchw.dtype),
            grid_spec=pltpu.PrefetchScalarGridSpec(
                num_scalar_prefetch=0,
                grid=(B, n_chunks),
                in_specs=[
                    pl.BlockSpec((None, C, chunk), lambda b, c: (b, 0, c)),
                    pl.BlockSpec((None, C, 128), lambda b, c: (b, 0, 0)),
                ],
                out_specs=pl.BlockSpec((None, C, chunk), lambda b, c: (b, 0, c)),
            ),
            compiler_params=pltpu.CompilerParams(
                dimension_semantics=("parallel", "parallel"),
                vmem_limit_bytes=_VMEM_LIMIT),
        )(x3, gate)

    if masked:
        out3 = out3[:, :, :hw]
    return out3.reshape(B, C, H, W)


# --------------------------------- reference ----------------------------------

def _reference(x, w1, w_dw, w2):
    # Pure-JAX reference matching the PyTorch forward semantics.
    B, C, H, W = x.shape
    mid = w1.shape[0]
    avg = jnp.mean(x, axis=(2, 3))   # (B, C)
    mx = jnp.max(x, axis=(2, 3))     # (B, C)
    W1 = w1.reshape(mid, C)
    Wdw = w_dw[:, 0, 1, 1]
    W2 = w2.reshape(C, mid)

    def branch(v):
        h = v @ W1.T
        h = h * Wdw
        h = jax.nn.gelu(h, approximate=False)
        return h @ W2.T

    out = branch(avg) + branch(mx)
    gate = jax.nn.sigmoid(out)[:, :, None, None]
    return x * gate


if __name__ == "__main__":
    def run_case(key, B, C, H, W, ratio=8, shift=0.0):
        mid = C // ratio
        kx, k1, k2, k3 = jax.random.split(key, 4)
        x = jax.random.normal(kx, (B, C, H, W), jnp.float32) + shift
        # Deterministic synthetic parameters (shapes from __init__; no checkpoint).
        w1 = jax.random.normal(k1, (mid, C, 1, 1), jnp.float32) * 0.1   # fc1[0]
        w_dw = jax.random.normal(k2, (mid, 1, 3, 3), jnp.float32) * 0.1  # fc1[1] dw
        w2 = jax.random.normal(k3, (C, mid, 1, 1), jnp.float32) * 0.1    # fc2
        y = jax.block_until_ready(multi_scale_channel_attention(x, w1, w_dw, w2))
        y_ref = _reference(x, w1, w_dw, w2)
        assert y.shape == x.shape and y.dtype == x.dtype
        assert jnp.allclose(y, y_ref, atol=1e-4, rtol=1e-4), \
            f"mismatch vs reference for shape {(B, C, H, W)}"

    key = jax.random.PRNGKey(0)
    k1, k2, k3 = jax.random.split(key, 3)
    run_case(k1, 2, 64, 16, 16)                   # fused single-pass path
    run_case(k2, 1, 64, 10, 10, shift=-5.0)       # padded H*W -> masked-max path
    run_case(k3, 1, 128, 96, 96)                  # tiled two-pass path

    print("KERNEL_OK")
</pallas_src>

<mosaic_0001>
module attributes {stable_mosaic.version = 11 : i64} {
  func.func @_fused_kernel(%arg0: i32, %arg1: memref<1x64x256xf32, #tpu.memory_space<vmem>>, %arg2: memref<8x64xf32, #tpu.memory_space<vmem>>, %arg3: memref<8x1xf32, #tpu.memory_space<vmem>>, %arg4: memref<64x8xf32, #tpu.memory_space<vmem>>, %arg5: memref<1x64x256xf32, #tpu.memory_space<vmem>>) attributes {dimension_semantics = [#tpu.dimension_semantics<parallel>], iteration_bounds = array<i64: 2>, scalar_prefetch = 0 : i64, scratch_operands = 0 : i64, tpu.core_type = #tpu.core_type<tc>, window_params = [{transform_indices = @transform_0, window_bounds = array<i64: 1, 64, 256>}, {pipeline_mode = #tpu.pipeline_mode<synchronous>, transform_indices = @transform_1, window_bounds = array<i64: 8, 64>}, {pipeline_mode = #tpu.pipeline_mode<synchronous>, transform_indices = @transform_2, window_bounds = array<i64: 8, 1>}, {pipeline_mode = #tpu.pipeline_mode<synchronous>, transform_indices = @transform_3, window_bounds = array<i64: 64, 8>}, {transform_indices = @transform_4, window_bounds = array<i64: 1, 64, 256>}]} {
    %cst = arith.constant 0.000000e+00 : f32
    %0 = vector.broadcast %cst : f32 to vector<64x128xf32>
    %cst_0 = arith.constant 0xFF800000 : f32
    %1 = vector.broadcast %cst_0 : f32 to vector<64x128xf32>
    %c0_i32 = arith.constant 0 : i32
    %c128_i32 = arith.constant 128 : i32
    %2 = arith.muli %c0_i32, %c128_i32 : i32
    %3 = tpu.assume_multiple %2, 128 : i32
    %c0 = arith.constant 0 : index
    %c0_1 = arith.constant 0 : index
    %4 = arith.index_cast %3 : i32 to index
    %5 = vector.load %arg1[%c0, %c0_1, %4] : memref<1x64x256xf32, #tpu.memory_space<vmem>>, vector<1x64x128xf32>
    %6 = vector.shape_cast %5 : vector<1x64x128xf32> to vector<64x128xf32>
    %7 = arith.addf %0, %6 : vector<64x128xf32>
    %8 = arith.maximumf %1, %6 : vector<64x128xf32>
    %c1_i32 = arith.constant 1 : i32
    %c128_i32_2 = arith.constant 128 : i32
    %9 = arith.muli %c1_i32, %c128_i32_2 : i32
    %10 = tpu.assume_multiple %9, 128 : i32
    %c0_3 = arith.constant 0 : index
    %c0_4 = arith.constant 0 : index
    %11 = arith.index_cast %10 : i32 to index
    %12 = vector.load %arg1[%c0_3, %c0_4, %11] : memref<1x64x256xf32, #tpu.memory_space<vmem>>, vector<1x64x128xf32>
    %13 = vector.shape_cast %12 : vector<1x64x128xf32> to vector<64x128xf32>
    %14 = arith.addf %7, %13 : vector<64x128xf32>
    %15 = arith.maximumf %8, %13 : vector<64x128xf32>
    %c2_i32 = arith.constant 2 : i32
    %cst_5 = arith.constant dense<0.000000e+00> : vector<64xf32>
    %16 = vector.multi_reduction <add>, %14, %cst_5 [1] : vector<64x128xf32> to vector<64xf32>
    %17 = vector.shape_cast %16 : vector<64xf32> to vector<64x1xf32>
    %cst_6 = arith.constant 3.906250e-03 : f32
    %18 = vector.broadcast %cst_6 : f32 to vector<64x1xf32>
    %19 = arith.mulf %17, %18 : vector<64x1xf32>
    %cst_7 = arith.constant dense<0xFF800000> : vector<64xf32>
    %20 = vector.multi_reduction <maximumf>, %15, %cst_7 [1] : vector<64x128xf32> to vector<64xf32>
    %21 = vector.shape_cast %20 : vector<64xf32> to vector<64x1xf32>
    %22 = tpu.iota {dimensions = array<i32: 1>} : vector<64x2xi32>
    %c0_i32_8 = arith.constant 0 : i32
    %23 = vector.broadcast %c0_i32_8 : i32 to vector<64x2xi32>
    %24 = arith.cmpi eq, %22, %23 : vector<64x2xi32>
    %25 = vector.shape_cast %19 : vector<64x1xf32> to vector<64x1xf32>
    %26 = vector.broadcast %25 : vector<64x1xf32> to vector<64x2xf32>
    %27 = vector.shape_cast %21 : vector<64x1xf32> to vector<64x1xf32>
    %28 = vector.broadcast %27 : vector<64x1xf32> to vector<64x2xf32>
    %29 = arith.select %24, %26, %28 : vector<64x2xi1>, vector<64x2xf32>
    %c0_9 = arith.constant 0 : index
    %c0_10 = arith.constant 0 : index
    %30 = vector.load %arg2[%c0_9, %c0_10] : memref<8x64xf32, #tpu.memory_space<vmem>>, vector<8x64xf32>
    %c0_11 = arith.constant 0 : index
    %c0_12 = arith.constant 0 : index
    %31 = vector.load %arg3[%c0_11, %c0_12] : memref<8x1xf32, #tpu.memory_space<vmem>>, vector<8x1xf32>
    %c0_13 = arith.constant 0 : index
    %c0_14 = arith.constant 0 : index
    %32 = vector.load %arg4[%c0_13, %c0_14] : memref<64x8xf32, #tpu.memory_space<vmem>>, vector<64x8xf32>
    %cst_15 = arith.constant dense<0.000000e+00> : vector<8x2xf32>
    %33 = tpu.matmul %30, %29, %cst_15 {dimension_numbers = #tpu.dot_dimension_numbers<[1], [0], [0], [1], [0, 0, 1, 1], [], []>} : vector<8x64xf32>, vector<64x2xf32>, vector<8x2xf32> -> vector<8x2xf32>
    %34 = vector.broadcast %31 : vector<8x1xf32> to vector<8x2xf32>
    %35 = arith.mulf %33, %34 : vector<8x2xf32>
    %cst_16 = arith.constant 5.000000e-01 : f32
    %36 = vector.broadcast %cst_16 : f32 to vector<8x2xf32>
    %37 = arith.mulf %36, %35 : vector<8x2xf32>
    %cst_17 = arith.constant 0.707106769 : f32
    %38 = vector.broadcast %cst_17 : f32 to vector<8x2xf32>
    %39 = arith.mulf %35, %38 : vector<8x2xf32>
    %cst_18 = arith.constant 0.000000e+00 : f32
    %40 = vector.broadcast %cst_18 : f32 to vector<8x2xf32>
    %41 = arith.cmpf oge, %39, %40 : vector<8x2xf32>
    %cst_19 = arith.constant 1.000000e+00 : f32
    %cst_20 = arith.constant -1.000000e+00 : f32
    %42 = vector.broadcast %cst_19 : f32 to vector<8x2xf32>
    %43 = vector.broadcast %cst_20 : f32 to vector<8x2xf32>
    %44 = arith.select %41, %42, %43 : vector<8x2xi1>, vector<8x2xf32>
    %45 = math.absf %39 : vector<8x2xf32>
    %cst_21 = arith.constant 0.327591091 : f32
    %46 = vector.broadcast %cst_21 : f32 to vector<8x2xf32>
    %47 = arith.mulf %46, %45 : vector<8x2xf32>
    %cst_22 = arith.constant 1.000000e+00 : f32
    %48 = vector.broadcast %cst_22 : f32 to vector<8x2xf32>
    %49 = arith.addf %48, %47 : vector<8x2xf32>
    %cst_23 = arith.constant 1.000000e+00 : f32
    %50 = vector.broadcast %cst_23 : f32 to vector<8x2xf32>
    %51 = arith.divf %50, %49 : vector<8x2xf32>
    %cst_24 = arith.constant 1.06140542 : f32
    %52 = vector.broadcast %cst_24 : f32 to vector<8x2xf32>
    %53 = arith.mulf %52, %51 : vector<8x2xf32>
    %cst_25 = arith.constant -1.45315206 : f32
    %54 = vector.broadcast %cst_25 : f32 to vector<8x2xf32>
    %55 = arith.addf %53, %54 : vector<8x2xf32>
    %56 = arith.mulf %55, %51 : vector<8x2xf32>
    %cst_26 = arith.constant 1.42141378 : f32
    %57 = vector.broadcast %cst_26 : f32 to vector<8x2xf32>
    %58 = arith.addf %56, %57 : vector<8x2xf32>
    %59 = arith.mulf %58, %51 : vector<8x2xf32>
    %cst_27 = arith.constant -0.284496725 : f32
    %60 = vector.broadcast %cst_27 : f32 to vector<8x2xf32>
    %61 = arith.addf %59, %60 : vector<8x2xf32>
    %62 = arith.mulf %61, %51 : vector<8x2xf32>
    %cst_28 = arith.constant 0.254829586 : f32
    %63 = vector.broadcast %cst_28 : f32 to vector<8x2xf32>
    %64 = arith.addf %62, %63 : vector<8x2xf32>
    %65 = arith.mulf %64, %51 : vector<8x2xf32>
    %cst_29 = arith.constant 0.000000e+00 : f32
    %66 = vector.broadcast %cst_29 : f32 to vector<8x2xf32>
    %67 = arith.subf %66, %45 : vector<8x2xf32>
    %68 = arith.mulf %67, %45 : vector<8x2xf32>
    %69 = math.exp %68 : vector<8x2xf32>
    %70 = arith.mulf %65, %69 : vector<8x2xf32>
    %cst_30 = arith.constant 1.000000e+00 : f32
    %71 = vector.broadcast %cst_30 : f32 to vector<8x2xf32>
    %72 = arith.subf %71, %70 : vector<8x2xf32>
    %73 = arith.mulf %44, %72 : vector<8x2xf32>
    %cst_31 = arith.constant 1.000000e+00 : f32
    %74 = vector.broadcast %cst_31 : f32 to vector<8x2xf32>
    %75 = arith.addf %74, %73 : vector<8x2xf32>
    %76 = arith.mulf %37, %75 : vector<8x2xf32>
    %cst_32 = arith.constant dense<0.000000e+00> : vector<64x2xf32>
    %77 = tpu.matmul %32, %76, %cst_32 {dimension_numbers = #tpu.dot_dimension_numbers<[1], [0], [0], [1], [0, 0, 1, 1], [], []>} : vector<64x8xf32>, vector<8x2xf32>, vector<64x2xf32> -> vector<64x2xf32>
    %cst_33 = arith.constant dense<0.000000e+00> : vector<64xf32>
    %78 = vector.multi_reduction <add>, %77, %cst_33 [1] : vector<64x2xf32> to vector<64xf32>
    %79 = vector.shape_cast %78 : vector<64xf32> to vector<64x1xf32>
    %80 = arith.negf %79 : vector<64x1xf32>
    %81 = math.exp %80 : vector<64x1xf32>
    %cst_34 = arith.constant 1.000000e+00 : f32
    %82 = vector.broadcast %cst_34 : f32 to vector<64x1xf32>
    %83 = arith.addf %82, %81 : vector<64x1xf32>
    %84 = arith.divf %82, %83 : vector<64x1xf32>
    %c0_35 = arith.constant 0 : index
    %c0_36 = arith.constant 0 : index
    %c0_37 = arith.constant 0 : index
    %85 = vector.load %arg1[%c0_35, %c0_36, %c0_37] : memref<1x64x256xf32, #tpu.memory_space<vmem>>, vector<1x64x256xf32>
    %86 = vector.shape_cast %85 : vector<1x64x256xf32> to vector<64x256xf32>
    %87 = vector.broadcast %84 : vector<64x1xf32> to vector<64x256xf32>
    %88 = arith.mulf %86, %87 : vector<64x256xf32>
    %c0_38 = arith.constant 0 : index
    %c0_39 = arith.constant 0 : index
    %c0_40 = arith.constant 0 : index
    %89 = vector.load %arg5[%c0_38, %c0_39, %c0_40] : memref<1x64x256xf32, #tpu.memory_space<vmem>>, vector<1x64x256xf32>
    %90 = vector.shape_cast %89 : vector<1x64x256xf32> to vector<64x256xf32>
    %91 = vector.shape_cast %88 : vector<64x256xf32> to vector<1x64x256xf32>
    tpu.vector_store %arg5[%c0_38, %c0_39, %c0_40], %91 {strides = array<i32>} : memref<1x64x256xf32, #tpu.memory_space<vmem>>, vector<1x64x256xf32>,
    return
  }
  func.func @transform_0(%arg0: i32) -> (i32, i32, i32) {
    %c0_i32 = arith.constant 0 : i32
    %c0_i32_0 = arith.constant 0 : i32
    %c0_i32_1 = arith.constant 0 : i32
    return %arg0, %c0_i32, %c0_i32_0 : i32, i32, i32
  }
  func.func @transform_1(%arg0: i32) -> (i32, i32) {
    %c0_i32 = arith.constant 0 : i32
    %c0_i32_0 = arith.constant 0 : i32
    %c0_i32_1 = arith.constant 0 : i32
    return %c0_i32, %c0_i32_0 : i32, i32
  }
  func.func @transform_2(%arg0: i32) -> (i32, i32) {
    %c0_i32 = arith.constant 0 : i32
    %c0_i32_0 = arith.constant 0 : i32
    %c0_i32_1 = arith.constant 0 : i32
    return %c0_i32, %c0_i32_0 : i32, i32
  }
  func.func @transform_3(%arg0: i32) -> (i32, i32) {
    %c0_i32 = arith.constant 0 : i32
    %c0_i32_0 = arith.constant 0 : i32
    %c0_i32_1 = arith.constant 0 : i32
    return %c0_i32, %c0_i32_0 : i32, i32
  }
  func.func @transform_4(%arg0: i32) -> (i32, i32, i32) {
    %c0_i32 = arith.constant 0 : i32
    %c0_i32_0 = arith.constant 0 : i32
    %c0_i32_1 = arith.constant 0 : i32
    return %arg0, %c0_i32, %c0_i32_0 : i32, i32, i32
  }
}

</mosaic_0001>

<bundles_post_ra>
// kernel: multi_scale_channel_attention.1
= control target key start
LH: loop header
LB: loop body
LE: loop exit
PB: predicated region body
PF: predicated region fallthrough
CT: control target
= control target key end

     0   :  { %s902_s15 = smov 0   ;;  %s1096_s0 = inlined_call_operand.vmem [shape: f32[2,64,256], index: 0, kind: input, shape index: {}]   ;;  %s1097_s1 = inlined_call_operand.vmem [shape: f32[8,64], index: 1, kind: input, shape index: {}]   ;;  %s1098_s2 = inlined_call_operand.vmem [shape: f32[8,1], index: 2, kind: input, shape index: {}]   ;;  %s1099_s3 = inlined_call_operand.vmem [shape: f32[64,8], index: 3, kind: input, shape index: {}]   ;;  %s1100_s4 = inlined_call_operand.vmem [shape: f32[2,64,256], index: 4, kind: output, shape index: {}]  }
   0x1 LB: > { %s713_s16 = sadd.s32 4294967295, %s870_s15   ;;  %p717_p0 = scmp.ge.s32.totalorder %s870_s15, 1  ;;  %s870_s15 = sphi %s902_s15, %s14_s15  }
   0x2   : > { %p162_p1 = scmp.lt.s32.totalorder %s870_s15, 3 }
   0x4   : > { %p163_p2 = pnand %p717_p0, %p162_p1 }
   0x5   : > { %p188_p3 = scmp.lt.s32.totalorder (!%p163_p2), %s713_s16, 1  ;;  %v872_v30 = vmov (!%p163_p2), 0.0|0.0   ;;  %vm873_vm0 = vmmov (!%p163_p2), 0   ;;  %v874_v33 = vmov (!%p163_p2), 0.0   ;;  %v291_v34 = vld [vmem:[%s1098_s2] sm:$0xff] (!%p163_p2)  ;;  %v875_v35 = vmov (!%p163_p2), 0  }
   0x6   : > { %166 = sbr.rel (%p163_p2) target bundleno = 870 (0x366), region = 36  ;;  %802 = vmatprep.subr.bf16.mxu0 (!%p163_p2), %v872_v30  ;;  %785 = vmatprep.mubr.msk.f32.mxu0 (!%p163_p2), %vm873_vm0, %v874_v33  ;;  %v279_v36 = vlaneseq (!%p163_p2)  ;;  %vm300_vm2 = vcmask (!%p163_p2), 523264   ;;  %vm407_vm3 = vcmask (!%p163_p2), 64512   ;;  %vm537_vm5 = vcmask (!%p163_p2), 15360  }
   0x7   : > { %827 = vset.pattern.permute.xlu0 (!%p163_p2), %v875_v35 }
   0x8   : > { %v280_v39 = vand.u32 (!%p163_p2), 127, %v279_v36 }
   0xa   : > { %vm281_vm1 = vcmp.eq.s32.totalorder (!%p163_p2), %v280_v39, 0 }
   0xd   : > { %s1102_s16 = smov (!%p188_p3, %s713_s16), 1 }
   0xe   : > { %s749_s17 = sshll.u32 %s1102_s16, 7 }
   0xf   : > { %s918_s20 = scalar_lea.vmem %s1096_s0, %s749_s17 }
  0x10   : > { %v921_v0 = vld [vmem:[%s918_s20] sm:$0xff]  ;;  %v924_v1 = vld [vmem:[%s918_s20 + $0x8] sm:$0xff]  ;;  %v927_v2 = vld [vmem:[%s918_s20 + $0x10] sm:$0xff] }
  0x11   : > { %v231_v3 = vmax.f32 %v921_v0, %v924_v1  ;;  %v223_v4 = vadd.f32 %v924_v1, %v921_v0  ;;  %v934_v5 = vld [vmem:[%s918_s20 + $0x18] sm:$0xff]  ;;  %v941_v8 = vld [vmem:[%s918_s20 + $0x30] sm:$0xff]  ;;  %v947_v10 = vld [vmem:[%s918_s20 + $0x20] sm:$0xff] }
  0x12   : > { %v232_v6 = vmax.f32 %v927_v2, %v934_v5  ;;  %v224_v7 = vadd.f32 %v934_v5, %v927_v2  ;;  %v944_v9 = vld [vmem:[%s918_s20 + $0x38] sm:$0xff]  ;;  %v950_v11 = vld [vmem:[%s918_s20 + $0x28] sm:$0xff]  ;;  %v961_v16 = vld [vmem:[%s918_s20 + $0x50] sm:$0xff] }
  0x13   : > { %263 = vmax.xlane.f32.xlu1 %v231_v3  ;;  %239 = vadd.xlane.f32.xlu0 %v223_v4  ;;  %v226_v12 = vadd.f32 %v944_v9, %v941_v8  ;;  %v225_v13 = vadd.f32 %v950_v11, %v947_v10  ;;  %v234_v14 = vmax.f32 %v941_v8, %v944_v9  ;;  %v964_v17 = vld [vmem:[%s918_s20 + $0x58] sm:$0xff]  ;;  %v967_v18 = vld [vmem:[%s918_s20 + $0x40] sm:$0xff]  ;;  %v970_v19 = vld [vmem:[%s918_s20 + $0x48] sm:$0xff] }
  0x14   : > { %v233_v15 = vmax.f32 %v947_v10, %v950_v11  ;;  %v228_v20 = vadd.f32 %v964_v17, %v961_v16  ;;  %v227_v21 = vadd.f32 %v970_v19, %v967_v18  ;;  %v236_v22 = vmax.f32 %v961_v16, %v964_v17  ;;  %v981_v24 = vld [vmem:[%s918_s20 + $0x70] sm:$0xff]  ;;  %v984_v25 = vld [vmem:[%s918_s20 + $0x78] sm:$0xff]  ;;  %v987_v26 = vld [vmem:[%s918_s20 + $0x60] sm:$0xff] }
  0x15   : > { %v235_v23 = vmax.f32 %v967_v18, %v970_v19  ;;  %v990_v27 = vld [vmem:[%s918_s20 + $0x68] sm:$0xff]  ;;  %v230_v28 = vadd.f32 %v984_v25, %v981_v24  ;;  %v238_v31 = vmax.f32 %v981_v24, %v984_v25  ;;  %s1059_s20 = scalar_lea.vmem %s1100_s4, %s749_s17 }
  0x16   : > { %v229_v29 = vadd.f32 %v990_v27, %v987_v26  ;;  %v237_v32 = vmax.f32 %v987_v26, %v990_v27 }
  0x17   : > { %265 = vmax.xlane.f32.xlu1 %v232_v6  ;;  %241 = vadd.xlane.f32.xlu0 %v224_v7 }
  0x1b   : > { %245 = vadd.xlane.f32.xlu1 %v226_v12  ;;  %243 = vadd.xlane.f32.xlu0 %v225_v13 }
  0x1f   : > { %269 = vmax.xlane.f32.xlu1 %v234_v14  ;;  %267 = vmax.xlane.f32.xlu0 %v233_v15 }
  0x23   : > { %249 = vadd.xlane.f32.xlu1 %v228_v20  ;;  %247 = vadd.xlane.f32.xlu0 %v227_v21 }
  0x27   : > { %273 = vmax.xlane.f32.xlu1 %v236_v22  ;;  %271 = vmax.xlane.f32.xlu0 %v235_v23  ;;  %v290_v22 = vld [vmem:[%s1097_s1] sm:$0xff] }
  0x28   : > { %v292_v23 = vld [vmem:[%s1099_s3] sm:$0xff] }
  0x29   : > { %790 = vmatprep.mubr.msk.f32.mxu1 %vm407_vm3, %v292_v23 }
  0x2b   : > { %253 = vadd.xlane.f32.xlu1 %v230_v28  ;;  %251 = vadd.xlane.f32.xlu0 %v229_v29 }
  0x2f   : > { %277 = vmax.xlane.f32.xlu1 %v238_v31  ;;  %275 = vmax.xlane.f32.xlu0 %v237_v32 }
  0x45   : > { %376 = vperm.xlu0 %827, %v291_v34  }
  0xa0   : > { %v264_v37 = vpop.xlane.xlu1 %263  ;;  %v240_v38 = vpop.xlane.xlu0 %239 }
  0xa1   : > { %v255_v40 = vmul.f32 0.00390625, %v240_v38 }
  0xa3   : > { %v282_v44 = vsel %vm281_vm1, %v255_v40, %v264_v37 }
  0xa4   : > { %v266_v41 = vpop.xlane.xlu1 %265  ;;  %v242_v42 = vpop.xlane.xlu0 %241 }
  0xa5   : > { %v256_v43 = vmul.f32 0.00390625, %v242_v42 }
  0xa7   : > { %v283_v45 = vsel %vm281_vm1, %v256_v43, %v266_v41 }
  0xa8   : > { %v246_v46 = vpop.xlane.xlu1 %245  ;;  %v244_v47 = vpop.xlane.xlu0 %243  ;;  %v803_v48 = vpack.c.bf16 %v283_v45, %v282_v44 }
  0xa9   : > { %v258_v49 = vmul.f32 0.00390625, %v246_v46  ;;  %v257_v50 = vmul.f32 0.00390625, %v244_v47 }
  0xaa   : > { %804 = vmatpush3.bf16.msra.mxu0 %v803_v48 }
  0xab   : > { %805 = vmatprep.subr.bf16.mxu0 %v872_v30 }
  0xac   : > { %v270_v51 = vpop.xlane.xlu1 %269  ;;  %v268_v52 = vpop.xlane.xlu0 %267 }
  0xad   : > { %v285_v53 = vsel %vm281_vm1, %v258_v49, %v270_v51  ;;  %v284_v54 = vsel %vm281_vm1, %v257_v50, %v268_v52  ;;  %v876_v52 = vmov -1.0  }
  0xae   : > { %v806_v55 = vpack.c.bf16 %v285_v53, %v284_v54 }
  0xb0   : > { %v250_v56 = vpop.xlane.xlu1 %249  ;;  %807 = vmatpush3.bf16.msra.mxu0 %v806_v55  ;;  %v248_v57 = vpop.xlane.xlu0 %247 }
  0xb1   : > { %808 = vmatprep.subr.bf16.mxu0 %v872_v30  ;;  %v260_v58 = vmul.f32 0.00390625, %v250_v56  ;;  %v259_v59 = vmul.f32 0.00390625, %v248_v57 }
  0xb4   : > { %v274_v60 = vpop.xlane.xlu1 %273  ;;  %v272_v61 = vpop.xlane.xlu0 %271 }
  0xb5   : > { %v287_v62 = vsel %vm281_vm1, %v260_v58, %v274_v60  ;;  %v286_v63 = vsel %vm281_vm1, %v259_v59, %v272_v61  ;;  %v293_v58 = vld [vmem:[%s1099_s3 + $0x8] sm:$0xff]  ;;  %v294_v59 = vld [vmem:[%s1099_s3 + $0x10] sm:$0xff]  ;;  %v295_v60 = vld [vmem:[%s1099_s3 + $0x18] sm:$0xff] }
  0xb6   : > { %v809_v3 = vpack.c.bf16 %v287_v62, %v286_v63  ;;  %v296_v61 = vld [vmem:[%s1099_s3 + $0x20] sm:$0xff]  ;;  %v297_v62 = vld [vmem:[%s1099_s3 + $0x28] sm:$0xff]  ;;  %v298_v63 = vld [vmem:[%s1099_s3 + $0x30] sm:$0xff] }
  0xb8   : > { %v254_v4 = vpop.xlane.xlu1 %253  ;;  %810 = vmatpush3.bf16.msra.mxu0 %v809_v3  ;;  %v252_v6 = vpop.xlane.xlu0 %251  ;;  %v299_v3 = vld [vmem:[%s1099_s3 + $0x38] sm:$0xff] }
  0xb9   : > { %811 = vmatprep.subr.bf16.mxu0 %v872_v30  ;;  %v262_v7 = vmul.f32 0.00390625, %v254_v4  ;;  %v261_v12 = vmul.f32 0.00390625, %v252_v6 }
  0xbc   : > { %v278_v13 = vpop.xlane.xlu1 %277  ;;  %v276_v14 = vpop.xlane.xlu0 %275 }
  0xbd   : > { %v289_v15 = vsel %vm281_vm1, %v262_v7, %v278_v13  ;;  %v288_v20 = vsel %vm281_vm1, %v261_v12, %v276_v14 }
  0xbe   : > { %v812_v21 = vpack.c.bf16 %v289_v15, %v288_v20 }
  0xc0   : > { %813 = vmatpush3.bf16.msra.mxu0 %v812_v21 }
  0xc3   : > { %786 = vmatmul.mubr.msk.f32.vlgmr.msra.gmra.mrb[0].mxu0 %vm300_vm2, %v290_v22 }
  0xc4   : > { %v377_v28 = vpop.permute.xlu0 %376 }
 0x196   : > { %v370_v29 = vpop.f32.mrb[0].mxu0 }
 0x197   : > { %v379_v30 = vmul.f32 %v377_v28, %v370_v29  ;;  %v787_v31 = vpop.f32.mrb[1].mxu0 }
 0x199   : > { %v381_v32 = vmul.f32 0.70710677, %v379_v30  ;;  %v380_v55 = vmul.f32 0.5, %v379_v30 }
 0x19b   : > { %v384_v33 = vand.u32 2147483647, %v381_v32  ;;  %vm382_vm4 = vcmp.ge.f32.partialorder %v381_v32, 0.0 }
 0x19c   : > { %v383_v53 = vsel %vm382_vm4, 1.0, %v876_v52 }
 0x19d   : > { %v385_v34 = vmul.f32 0.3275911, %v384_v33  ;;  %v398_v36 = vsub.f32 0.0, %v384_v33 }
 0x19f   : > { %v386_v35 = vadd.f32 1.0, %v385_v34  ;;  %v399_v38 = vmul.f32 %v398_v36, %v384_v33 }
 0x1a1   : > { %828 = vrcp.f32 %v386_v35  ;;  %v400_v41 = vmul.f32 1.442695, %v399_v38 }
 0x1a3   : > { %830 = vpow2.f32 %v400_v41 }
 0x1ab   : > { %v829_v37 = vpop.eup %828 }
 0x1ac   : > { %v389_v39 = vmul.f32 1.0614054, %v829_v37 }
 0x1ad   : > { %v831_v49 = vpop.eup %830 }
 0x1ae   : > { %v390_v40 = vadd.f32 -1.4531521, %v389_v39 }
 0x1b0   : > { %v391_v42 = vmul.f32 %v829_v37, %v390_v40 }
 0x1b2   : > { %v392_v43 = vadd.f32 1.4214138, %v391_v42 }
 0x1b4   : > { %v393_v44 = vmul.f32 %v829_v37, %v392_v43 }
 0x1b6   : > { %v394_v45 = vadd.f32 -0.28449672, %v393_v44 }
 0x1b8   : > { %v395_v46 = vmul.f32 %v829_v37, %v394_v45 }
 0x1ba   : > { %v396_v47 = vadd.f32 0.2548296, %v395_v46 }
 0x1bc   : > { %v397_v48 = vmul.f32 %v829_v37, %v396_v47 }
 0x1be   : > { %v402_v50 = vmul.f32 %v831_v49, %v397_v48 }
 0x1c0   : > { %v403_v51 = vsub.f32 1.0, %v402_v50 }
 0x1c2   : > { %v404_v54 = vmul.f32 %v403_v51, %v383_v53 }
 0x1c4   : > { %v405_v56 = vadd.f32 1.0, %v404_v54 }
 0x1c6   : > { %v406_v57 = vmul.f32 %v405_v56, %v380_v55 }
 0x1c8   : > { %788 = vmatprep.subr.mxu1 %v406_v57 }
 0x1c9   : > { %789 = vmatpush3.msra.mxu1 %v406_v57 }
 0x1ca   : > { %791 = vmatmul.mubr.msk.f32.vlgmr.msra.gmra.mrb[0].mxu1 %vm407_vm3, %v293_v58 }
 0x1cb   : > { %793 = vmatprep.mubr.msk.f32.mxu1 %vm407_vm3, %v294_v59 }
 0x1ce   : > { %794 = vmatmul.mubr.msk.f32.gmra.mrb[2].mxu1 %vm407_vm3, %v295_v60 }
 0x1cf   : > { %796 = vmatprep.mubr.msk.f32.mxu1 %vm407_vm3, %v296_v61 }
 0x1d2   : > { %797 = vmatmul.mubr.msk.f32.gmra.mrb[4].mxu1 %vm407_vm3, %v297_v62 }
 0x1d3   : > { %799 = vmatprep.mubr.msk.f32.mxu1 %vm407_vm3, %v298_v63 }
 0x1d6   : > { %800 = vmatmul.mubr.msk.f32.gmra.mrb[6].mxu1 %vm407_vm3, %v299_v3 }
 0x29d   : > { %v792_v4 = vpop.f32.mrb[0].mxu1 }
 0x29e   : > { %v498_v6 = vpop.f32.mrb[1].mxu1  ;;  %v541_v7 = vsel %vm537_vm5, %v792_v4, 0.0 }
 0x29f   : > { %542 = vadd.xlane.f32.xlu1 %v541_v7  ;;  %v538_v13 = vsel %vm537_vm5, %v498_v6, 0.0 }
 0x2a1   : > { %v795_v12 = vpop.f32.mrb[2].mxu1 }
 0x2a2   : > { %v508_v14 = vpop.f32.mrb[3].mxu1  ;;  %v547_v15 = vsel %vm537_vm5, %v795_v12, 0.0 }
 0x2a3   : > { %539 = vadd.xlane.f32.xlu1 %v538_v13  ;;  %v544_v23 = vsel %vm537_vm5, %v508_v14, 0.0 }
 0x2a5   : > { %v798_v20 = vpop.f32.mrb[4].mxu1 }
 0x2a6   : > { %v518_v21 = vpop.f32.mrb[5].mxu1  ;;  %v553_v29 = vsel %vm537_vm5, %v798_v20, 0.0 }
 0x2a7   : > { %548 = vadd.xlane.f32.xlu1 %v547_v15  ;;  %v550_v30 = vsel %vm537_vm5, %v518_v21, 0.0 }
 0x2a9   : > { %v801_v22 = vpop.f32.mrb[6].mxu1 }
 0x2aa   : > { %v528_v28 = vpop.f32.mrb[7].mxu1  ;;  %v559_v32 = vsel %vm537_vm5, %v801_v22, 0.0 }
 0x2ab   : > { %545 = vadd.xlane.f32.xlu1 %v544_v23  ;;  %v556_v31 = vsel %vm537_vm5, %v528_v28, 0.0 }
 0x2af   : > { %554 = vadd.xlane.f32.xlu1 %v553_v29 }
 0x2b3   : > { %551 = vadd.xlane.f32.xlu1 %v550_v30 }
 0x2b7   : > { %557 = vadd.xlane.f32.xlu1 %v556_v31 }
 0x2bb   : > { %560 = vadd.xlane.f32.xlu1 %v559_v32 }
 0x32c   : > { %v543_v33 = vpop.xlane.xlu1 %542 }
 0x32d   : > { %v740_v34 = vmul.f32 -1.442695, %v543_v33 }
 0x32f   : > { %832 = vpow2.f32 %v740_v34 }
 0x330   : > { %v540_v35 = vpop.xlane.xlu1 %539 }
 0x331   : > { %v739_v36 = vmul.f32 -1.442695, %v540_v35 }
 0x333   : > { %834 = vpow2.f32 %v739_v36 }
 0x334   : > { %v549_v37 = vpop.xlane.xlu1 %548 }
 0x335   : > { %v742_v38 = vmul.f32 -1.442695, %v549_v37 }
 0x337   : > { %836 = vpow2.f32 %v742_v38 }
 0x338   : > { %v546_v39 = vpop.xlane.xlu1 %545 }
 0x339   : > { %v833_v40 = vpop.eup %832  ;;  %v741_v41 = vmul.f32 -1.442695, %v546_v39 }
 0x33a   : > { %v587_v42 = vadd.f32 1.0, %v833_v40 }
 0x33b   : > { %838 = vpow2.f32 %v741_v41 }
 0x33c   : > { %840 = vrcp.f32 %v587_v42  ;;  %v555_v43 = vpop.xlane.xlu1 %554 }
 0x33d   : > { %v835_v44 = vpop.eup %834  ;;  %v744_v45 = vmul.f32 -1.442695, %v555_v43 }
 0x33e   : > { %v586_v46 = vadd.f32 1.0, %v835_v44 }
 0x33f   : > { %842 = vpow2.f32 %v744_v45 }
 0x340   : > { %844 = vrcp.f32 %v586_v46  ;;  %v552_v47 = vpop.xlane.xlu1 %551 }
 0x341   : > { %v837_v48 = vpop.eup %836  ;;  %v743_v49 = vmul.f32 -1.442695, %v552_v47 }
 0x342   : > { %v589_v50 = vadd.f32 1.0, %v837_v48 }
 0x343   : > { %846 = vpow2.f32 %v743_v49 }
 0x344   : > { %848 = vrcp.f32 %v589_v50  ;;  %v558_v51 = vpop.xlane.xlu1 %557 }
 0x345   : > { %v839_v52 = vpop.eup %838  ;;  %v745_v53 = vmul.f32 -1.442695, %v558_v51 }
 0x346   : > { %v841_v54 = vpop.eup %840  ;;  %v588_v55 = vadd.f32 1.0, %v839_v52 }
 0x347   : > { %v628_v56 = vmul.f32 %v841_v54, %v927_v2  ;;  %v629_v57 = vmul.f32 %v841_v54, %v934_v5  ;;  %850 = vpow2.f32 %v745_v53 }
 0x348   : > { %852 = vrcp.f32 %v588_v55  ;;  %v561_v58 = vpop.xlane.xlu1 %560 }
 0x349   : > { %v843_v59 = vpop.eup %842  ;;  %644 = vst [vmem:[%s1059_s20 + $0x10] sm:$0xff] %v628_v56  ;;  %645 = vst [vmem:[%s1059_s20 + $0x18] sm:$0xff] %v629_v57  ;;  %v746_v60 = vmul.f32 -1.442695, %v561_v58 }
 0x34a   : > { %v845_v61 = vpop.eup %844  ;;  %v591_v62 = vadd.f32 1.0, %v843_v59 }
 0x34b   : > { %v626_v63 = vmul.f32 %v845_v61, %v921_v0  ;;  %v627_v3 = vmul.f32 %v845_v61, %v924_v1  ;;  %854 = vpow2.f32 %v746_v60 }
 0x34c   : > { %856 = vrcp.f32 %v591_v62 }
 0x34d   : > { %v847_v2 = vpop.eup %846  ;;  %642 = vst [vmem:[%s1059_s20] sm:$0xff] %v626_v63  ;;  %643 = vst [vmem:[%s1059_s20 + $0x8] sm:$0xff] %v627_v3 }
 0x34e   : > { %v849_v5 = vpop.eup %848  ;;  %v590_v4 = vadd.f32 1.0, %v847_v2 }
 0x34f   : > { %v632_v6 = vmul.f32 %v849_v5, %v941_v8  ;;  %v633_v7 = vmul.f32 %v849_v5, %v944_v9 }
 0x350   : > { %858 = vrcp.f32 %v590_v4 }
 0x351   : > { %v851_v12 = vpop.eup %850  ;;  %648 = vst [vmem:[%s1059_s20 + $0x30] sm:$0xff] %v632_v6  ;;  %649 = vst [vmem:[%s1059_s20 + $0x38] sm:$0xff] %v633_v7 }
 0x352   : > { %v853_v0 = vpop.eup %852  ;;  %v592_v1 = vadd.f32 1.0, %v851_v12 }
 0x353   : > { %v630_v13 = vmul.f32 %v853_v0, %v947_v10  ;;  %v631_v14 = vmul.f32 %v853_v0, %v950_v11 }
 0x354   : > { %860 = vrcp.f32 %v592_v1 }
 0x355   : > { %v855_v15 = vpop.eup %854  ;;  %646 = vst [vmem:[%s1059_s20 + $0x20] sm:$0xff] %v630_v13  ;;  %647 = vst [vmem:[%s1059_s20 + $0x28] sm:$0xff] %v631_v14 }
 0x356   : > { %v857_v8 = vpop.eup %856  ;;  %v593_v9 = vadd.f32 1.0, %v855_v15 }
 0x357   : > { %v636_v20 = vmul.f32 %v857_v8, %v961_v16  ;;  %v637_v21 = vmul.f32 %v857_v8, %v964_v17 }
 0x358   : > { %862 = vrcp.f32 %v593_v9 }
 0x359   : > { %652 = vst [vmem:[%s1059_s20 + $0x50] sm:$0xff] %v636_v20  ;;  %653 = vst [vmem:[%s1059_s20 + $0x58] sm:$0xff] %v637_v21 }
 0x35a   : > { %v859_v10 = vpop.eup %858 }
 0x35b   : > { %v634_v11 = vmul.f32 %v859_v10, %v967_v18  ;;  %v635_v22 = vmul.f32 %v859_v10, %v970_v19 }
 0x35d   : > { %650 = vst [vmem:[%s1059_s20 + $0x40] sm:$0xff] %v634_v11  ;;  %651 = vst [vmem:[%s1059_s20 + $0x48] sm:$0xff] %v635_v22 }
 0x35e   : > { %v861_v23 = vpop.eup %860 }
 0x35f   : > { %v638_v28 = vmul.f32 %v861_v23, %v987_v26  ;;  %v639_v29 = vmul.f32 %v861_v23, %v990_v27 }
 0x361   : > { %654 = vst [vmem:[%s1059_s20 + $0x60] sm:$0xff] %v638_v28  ;;  %655 = vst [vmem:[%s1059_s20 + $0x68] sm:$0xff] %v639_v29 }
 0x362   : > { %v863_v16 = vpop.eup %862 }
 0x363   : > { %v640_v17 = vmul.f32 %v863_v16, %v981_v24  ;;  %v641_v30 = vmul.f32 %v863_v16, %v984_v25 }
 0x365   : > { %656 = vst [vmem:[%s1059_s20 + $0x70] sm:$0xff] %v640_v17  ;;  %657 = vst [vmem:[%s1059_s20 + $0x78] sm:$0xff] %v641_v30 }
 0x366 PF: > { %s14_s15 = sadd.s32 1, %s870_s15  }
 0x367   : > { %p11_p4 = scmp.ge.s32.totalorder %s14_s15, 4  }
 0x369   :  { %13 = sbr.rel (!%p11_p4) target bundleno = 1 (0x1), region = 67 }

</bundles_post_ra>
